<compile_context>
chip_gen: v5e
topology: v5e:2x2
jax: 0.10.0
libtpu: 0.0.40
codegen_flags: <defaults>
</compile_context>

<pallas_src>
import functools

import jax
import jax.numpy as jnp
from jax import lax
from jax.experimental import pallas as pl
from jax.experimental.pallas import tpu as pltpu

_MIB = 1024 * 1024


def _round_up(x, m):
    return ((x + m - 1) // m) * m


def _second_minor_align(dtype):
    return {4: 8, 2: 16, 1: 32}.get(jnp.dtype(dtype).itemsize, 8)


def _vmem_budget_bytes():
    """Scoped-VMEM ceiling: physical capacity minus headroom (generation-aware)."""
    cap = 64 * _MIB  # conservative fallback (v7x-sized)
    try:
        cap = int(pltpu.get_tpu_info().vmem_capacity_bytes)
    except Exception:
        pass
    # ~20% headroom for Mosaic-internal scratch:
    #   64 MiB (v7x) -> ~51 MiB ; 128 MiB (v5e/v6e) -> ~102 MiB.
    return min(int(cap * 0.8), cap - 8 * _MIB)


def _resolve_tile(dim, requested, max_tile, aligns, min_tile):
    """Pick (tile, padded_dim). Prefers choices that need no padding:
    full-dim blocks (always layout-legal) or aligned exact divisors of dim."""
    if requested is not None:
        t = min(int(requested), dim)
        if t >= dim:
            return dim, dim
        t = max(_round_up(t, aligns[-1]), aligns[-1])
        if t >= dim:
            return dim, dim
        return t, _round_up(dim, t)
    if dim <= max_tile:
        return dim, dim                       # full-dim block: legal, unpadded
    for align in aligns:                      # larger (MXU-friendly) align first
        t = (max_tile // align) * align
        while t >= max(align, min_tile):
            if dim % t == 0:
                return t, dim                 # exact divisor: unpadded
            t -= align
    t = min(max_tile, 512)                    # fall back to padding
    return t, _round_up(dim, t)


def _weight_block_spec(tn, tk, extra_buffering):
    imap = lambda i, j, k: (j, k)
    if extra_buffering and hasattr(pl, "Buffered"):
        try:
            # 3-deep weight pipelining hides the W-tile DMA gap in the
            # weight-stream-bound (small-M) regime (mainly helps v5e).
            return pl.BlockSpec((tn, tk), imap, pipeline_mode=pl.Buffered(3))
        except TypeError:
            pass
    return pl.BlockSpec((tn, tk), imap)


def _linear_act_kernel(*refs, activation, use_bias, use_scratch, nk):
    x_ref, w_ref = refs[0], refs[1]
    idx = 2
    b_ref = None
    if use_bias:
        b_ref = refs[idx]
        idx += 1
    o_ref = refs[idx]
    idx += 1
    acc_ref = refs[idx] if use_scratch else o_ref

    # [tm, tk] x [tn, tk] -> [tm, tn], contracting the K dims. Mosaic handles
    # the transposed RHS at the MXU push, so the wrapper never transposes W.
    contrib = lax.dot_general(
        x_ref[...], w_ref[...],
        dimension_numbers=(((1,), (1,)), ((), ())),
        preferred_element_type=jnp.float32,
    )

    def _epilogue(acc):
        if use_bias:
            acc = acc + b_ref[...].astype(jnp.float32)
        # Transcendental activations hit the EUP slot -> ~free under an
        # MXU / weight-stream bound matmul.
        if activation == "relu":
            acc = jnp.maximum(acc, 0.0)
        elif activation == "tanh":
            acc = jnp.tanh(acc)
        elif activation == "sigmoid":
            acc = jax.nn.sigmoid(acc)
        return acc.astype(o_ref.dtype)

    if nk == 1:
        # Single K step: fuse matmul + bias + activation into one store.
        o_ref[...] = _epilogue(contrib)
        return

    k = pl.program_id(2)

    @pl.when(k == 0)
    def _():
        acc_ref[...] = contrib          # first partial product: no zero-init+add

    @pl.when(k > 0)
    def _():
        acc_ref[...] = acc_ref[...] + contrib

    if use_bias or (activation is not None) or use_scratch:
        @pl.when(k == nk - 1)
        def _():
            o_ref[...] = _epilogue(acc_ref[...])


def linear_activation(x, weight, bias=None, activation=None, *,
                      tile_m=None, tile_n=None, tile_k=None):
    """Pallas equivalent of LinearActivation.forward.

    x:      [..., K]  (leading dims flattened, like torch.nn.Linear)
    weight: [N, K]    (PyTorch layout [out_features, in_features]; NOT transposed)
    bias:   [N] or None
    activation: None | "relu" | "tanh" | "sigmoid"
    """
    # TODO(synk): arbitrary user-supplied activation callables are not fused
    # in-kernel; only the named activations above are implemented.
    orig_shape = x.shape
    K = orig_shape[-1]
    x2d = x.reshape(-1, K)
    M = x2d.shape[0]
    N, K2 = weight.shape
    assert K == K2, "in_features mismatch"

    out_dtype = x.dtype
    xb = jnp.dtype(x.dtype).itemsize
    wb = jnp.dtype(weight.dtype).itemsize
    ob = jnp.dtype(out_dtype).itemsize
    sub_m = _second_minor_align(x.dtype)

    # ---- tile selection (bigger ceilings; no padding unless unavoidable) ----
    max_tm, max_tn = 512, 512
    max_tk = 1024 if xb >= 4 else 2048

    tm, M_pad = _resolve_tile(M, tile_m, max_tm, (sub_m,), 128)
    tn, N_pad = _resolve_tile(N, tile_n, max_tn, (256, 128), 128)
    tk, K_pad = _resolve_tile(K, tile_k, max_tk, (256, 128), 256)

    gm, gn, gk = M_pad // tm, N_pad // tn, K_pad // tk

    # v7x has 2 TensorCores: if both parallel axes collapsed to one block,
    # split N into two blocks so the second core gets work (near-free on 1-TC).
    if (tile_n is None and gm == 1 and gn == 1 and N_pad == N
            and N >= 512 and N % 256 == 0):
        tn = N // 2
        gn = 2

    use_bias = bias is not None
    acc_in_out = jnp.dtype(out_dtype) == jnp.dtype(jnp.float32)
    use_scratch = (not acc_in_out) and gk > 1
    extra_w_buffering = (gm == 1) and (gn * gk >= 3)

    # ---- zero padding only when genuinely needed ----------------------------
    x_p = x2d
    if (M_pad, K_pad) != (M, K):
        x_p = jnp.pad(x2d, ((0, M_pad - M), (0, K_pad - K)))
    w_p = weight
    if (N_pad, K_pad) != (N, K):
        w_p = jnp.pad(weight, ((0, N_pad - N), (0, K_pad - K)))

    args = [x_p, w_p]
    in_specs = [
        pl.BlockSpec((tm, tk), lambda i, j, k: (i, k)),      # x tile
        _weight_block_spec(tn, tk, extra_w_buffering),        # W [N, K] panel
    ]
    if use_bias:
        b2d = bias.astype(jnp.float32).reshape(1, N)          # f32 add, tiny
        if N_pad != N:
            b2d = jnp.pad(b2d, ((0, 0), (0, N_pad - N)))
        args.append(b2d)
        in_specs.append(pl.BlockSpec((1, tn), lambda i, j, k: (0, j)))

    scratch_shapes = []
    if use_scratch:
        scratch_shapes.append(pltpu.VMEM((tm, tn), jnp.float32))

    # ---- generation-aware VMEM limit ----------------------------------------
    budget = _vmem_budget_bytes()
    w_bufs = 3 if extra_w_buffering else 2
    vmem_need = (
        2 * tm * tk * xb
        + w_bufs * tn * tk * wb
        + 2 * tm * tn * ob
        + (tm * tn * 4 if use_scratch else 0)
        + (2 * tn * 4 if use_bias else 0)
    )
    vmem_limit = int(min(budget, max(2 * vmem_need, 32 * _MIB)))
    vmem_limit = int(max(vmem_limit, vmem_need + 2 * _MIB))

    cost = pl.CostEstimate(
        flops=2 * M * N * K,
        transcendentals=M * N if activation in ("tanh", "sigmoid") else 0,
        bytes_accessed=M * K * xb + N * K * wb + M * N * ob
        + (N * 4 if use_bias else 0),
    )

    kernel = functools.partial(
        _linear_act_kernel,
        activation=activation,
        use_bias=use_bias,
        use_scratch=use_scratch,
        nk=gk,
    )

    out = pl.pallas_call(
        kernel,
        out_shape=jax.ShapeDtypeStruct((M_pad, N_pad), out_dtype),
        grid_spec=pltpu.PrefetchScalarGridSpec(
            num_scalar_prefetch=0,
            grid=(gm, gn, gk),
            in_specs=in_specs,
            out_specs=pl.BlockSpec((tm, tn), lambda i, j, k: (i, j)),
            scratch_shapes=scratch_shapes,
        ),
        compiler_params=pltpu.CompilerParams(
            dimension_semantics=("parallel", "parallel", "arbitrary"),
            vmem_limit_bytes=vmem_limit,
        ),
        cost_estimate=cost,
    )(*args)

    if (M_pad, N_pad) != (M, N):
        out = out[:M, :N]
    return out.reshape(orig_shape[:-1] + (N,))


def _ref_linear_activation(x, weight, bias, activation):
    y = jnp.matmul(x.astype(jnp.float32), weight.astype(jnp.float32).T,
                   precision=lax.Precision.HIGHEST)
    if bias is not None:
        y = y + bias.astype(jnp.float32)
    if activation == "relu":
        y = jnp.maximum(y, 0.0)
    elif activation == "tanh":
        y = jnp.tanh(y)
    elif activation == "sigmoid":
        y = jax.nn.sigmoid(y)
    return y


if __name__ == "__main__":
    key = jax.random.PRNGKey(0)

    def check(y, y_ref, atol, rtol, shape):
        assert y.shape == shape, (y.shape, shape)
        diff = jnp.max(jnp.abs(y.astype(jnp.float32) - y_ref))
        assert jnp.allclose(y.astype(jnp.float32), y_ref, atol=atol, rtol=rtol), float(diff)

    # --- Test 1: small module-like shapes (batch=8, 32 -> 64), bias + ReLU.
    batch, in_features, out_features = 8, 32, 64
    kx, kw, kb = jax.random.split(key, 3)
    x = jax.random.normal(kx, (batch, in_features), dtype=jnp.float32)
    weight = jax.random.normal(kw, (out_features, in_features), dtype=jnp.float32) * 0.1
    bias = jax.random.normal(kb, (out_features,), dtype=jnp.float32) * 0.1
    y = jax.block_until_ready(linear_activation(x, weight, bias, activation="relu"))
    check(y, _ref_linear_activation(x, weight, bias, "relu"), 1e-5, 1e-5,
          (batch, out_features))

    # --- Test 2: 3-D input (leading dims flattened), no bias, no activation.
    x3 = jax.random.normal(kx, (2, 4, in_features), dtype=jnp.float32)
    y2 = jax.block_until_ready(linear_activation(x3, weight, None, activation=None))
    check(y2, _ref_linear_activation(x3, weight, None, None), 1e-5, 1e-5,
          (2, 4, out_features))

    # --- Test 3: non-aligned shapes + forced ragged-M padding path, bias+sigmoid.
    M3, K3, N3 = 200, 160, 192
    k1, k2, k3 = jax.random.split(jax.random.PRNGKey(1), 3)
    xb_ = jax.random.normal(k1, (M3, K3), dtype=jnp.float32)
    wb_ = jax.random.normal(k2, (N3, K3), dtype=jnp.float32) * 0.1
    bb_ = jax.random.normal(k3, (N3,), dtype=jnp.float32) * 0.1
    y3 = jax.block_until_ready(
        linear_activation(xb_, wb_, bb_, activation="sigmoid", tile_m=128))
    check(y3, _ref_linear_activation(xb_, wb_, bb_, "sigmoid"), 1e-3, 1e-3, (M3, N3))

    # --- Test 4: bf16, multi-block (M, N, K) grid with f32 scratch accumulator,
    #             bias + tanh.
    M4, K4, N4 = 256, 512, 384
    k4, k5, k6 = jax.random.split(jax.random.PRNGKey(2), 3)
    x4 = jax.random.normal(k4, (M4, K4), dtype=jnp.bfloat16)
    w4 = (jax.random.normal(k5, (N4, K4), dtype=jnp.float32) * 0.05).astype(jnp.bfloat16)
    b4 = (jax.random.normal(k6, (N4,), dtype=jnp.float32) * 0.1).astype(jnp.bfloat16)
    y4 = jax.block_until_ready(
        linear_activation(x4, w4, b4, activation="tanh",
                          tile_m=128, tile_n=128, tile_k=256))
    check(y4, _ref_linear_activation(x4, w4, b4, "tanh"), 3e-2, 3e-2, (M4, N4))

    # --- Test 5: small-M weight-stream regime (triggers Buffered(3) weight
    #             pipelining) with multi-step K accumulation directly into o_ref.
    M5, K5, N5 = 8, 512, 256
    k7, k8, k9 = jax.random.split(jax.random.PRNGKey(3), 3)
    x5 = jax.random.normal(k7, (M5, K5), dtype=jnp.float32)
    w5 = jax.random.normal(k8, (N5, K5), dtype=jnp.float32) * 0.05
    b5 = jax.random.normal(k9, (N5,), dtype=jnp.float32) * 0.1
    y5 = jax.block_until_ready(
        linear_activation(x5, w5, b5, activation="relu", tile_n=128, tile_k=128))
    check(y5, _ref_linear_activation(x5, w5, b5, "relu"), 2e-3, 2e-3, (M5, N5))

    print("KERNEL_OK")
</pallas_src>

<mosaic_0001>
module attributes {stable_mosaic.version = 11 : i64} {
  func.func @_linear_act_kernel(%arg0: i32, %arg1: i32, %arg2: i32, %arg3: memref<8x32xf32, #tpu.memory_space<vmem>>, %arg4: memref<64x32xf32, #tpu.memory_space<vmem>>, %arg5: memref<1x64xf32, #tpu.memory_space<vmem>>, %arg6: memref<8x64xf32, #tpu.memory_space<vmem>>) attributes {dimension_semantics = [#tpu.dimension_semantics<parallel>, #tpu.dimension_semantics<parallel>, #tpu.dimension_semantics<arbitrary>], iteration_bounds = array<i64: 1, 1, 1>, scalar_prefetch = 0 : i64, scratch_operands = 0 : i64, tpu.core_type = #tpu.core_type<tc>, window_params = [{transform_indices = @transform_0, window_bounds = array<i64: 8, 32>}, {transform_indices = @transform_1, window_bounds = array<i64: 64, 32>}, {transform_indices = @transform_2, window_bounds = array<i64: 1, 64>}, {transform_indices = @transform_3, window_bounds = array<i64: 8, 64>}]} {
    %c0 = arith.constant 0 : index
    %c0_0 = arith.constant 0 : index
    %0 = vector.load %arg3[%c0, %c0_0] : memref<8x32xf32, #tpu.memory_space<vmem>>, vector<8x32xf32>
    %c0_1 = arith.constant 0 : index
    %c0_2 = arith.constant 0 : index
    %1 = vector.load %arg4[%c0_1, %c0_2] : memref<64x32xf32, #tpu.memory_space<vmem>>, vector<64x32xf32>
    %cst = arith.constant dense<0.000000e+00> : vector<8x64xf32>
    %2 = tpu.matmul %0, %1, %cst {dimension_numbers = #tpu.dot_dimension_numbers<[1], [1], [0], [0], [0, 0, 1, 0], [], []>} : vector<8x32xf32>, vector<64x32xf32>, vector<8x64xf32> -> vector<8x64xf32>
    %c0_3 = arith.constant 0 : index
    %c0_4 = arith.constant 0 : index
    %3 = vector.load %arg5[%c0_3, %c0_4] : memref<1x64xf32, #tpu.memory_space<vmem>>, vector<1x64xf32>
    %4 = vector.broadcast %3 : vector<1x64xf32> to vector<8x64xf32>
    %5 = arith.addf %2, %4 : vector<8x64xf32>
    %cst_5 = arith.constant 0.000000e+00 : f32
    %6 = vector.broadcast %cst_5 : f32 to vector<8x64xf32>
    %7 = arith.maximumf %5, %6 : vector<8x64xf32>
    %c0_6 = arith.constant 0 : index
    %c0_7 = arith.constant 0 : index
    %8 = vector.load %arg6[%c0_6, %c0_7] : memref<8x64xf32, #tpu.memory_space<vmem>>, vector<8x64xf32>
    tpu.vector_store %arg6[%c0_6, %c0_7], %7 {strides = array<i32>} : memref<8x64xf32, #tpu.memory_space<vmem>>, vector<8x64xf32>,
    return
  }
  func.func @transform_0(%arg0: i32, %arg1: i32, %arg2: i32) -> (i32, i32) {
    %c0_i32 = arith.constant 0 : i32
    return %arg0, %arg2 : i32, i32
  }
  func.func @transform_1(%arg0: i32, %arg1: i32, %arg2: i32) -> (i32, i32) {
    %c0_i32 = arith.constant 0 : i32
    return %arg1, %arg2 : i32, i32
  }
  func.func @transform_2(%arg0: i32, %arg1: i32, %arg2: i32) -> (i32, i32) {
    %c0_i32 = arith.constant 0 : i32
    %c0_i32_0 = arith.constant 0 : i32
    return %c0_i32, %arg1 : i32, i32
  }
  func.func @transform_3(%arg0: i32, %arg1: i32, %arg2: i32) -> (i32, i32) {
    %c0_i32 = arith.constant 0 : i32
    return %arg0, %arg1 : i32, i32
  }
}

</mosaic_0001>

<bundles_post_ra>
// kernel: tpu_custom_call.1
= control target key start
LH: loop header
LB: loop body
LE: loop exit
PB: predicated region body
PF: predicated region fallthrough
CT: control target
= control target key end

     0   :  { %vm28_vm0 = vcmask 261120   ;;  %s195_s0 = inlined_call_operand.vmem [shape: f32[8,32], index: 0, kind: input, shape index: {}]   ;;  %s196_s1 = inlined_call_operand.vmem [shape: f32[64,32], index: 1, kind: input, shape index: {}]   ;;  %s197_s2 = inlined_call_operand.vmem [shape: f32[1,64], index: 2, kind: input, shape index: {}]   ;;  %s198_s3 = inlined_call_operand.hbm [shape: f32[8,64], index: 3, kind: output, shape index: {}]  }
   0x1   :  { %v23_v0 = vld [vmem:[%s196_s1 + $0x38] sm:$0xff]  ;;  %v22_v1 = vld [vmem:[%s196_s1 + $0x30] sm:$0xff] }
   0x2   :  { %95 = vmatpush.xpose.msk.msra.mxu0 %vm28_vm0, %v23_v0 }
   0x3   :  { %8 = vsyncpa [#allocation3], 0  ;;  %v21_v2 = vld [vmem:[%s196_s1 + $0x28] sm:$0xff]  ;;  %v20_v3 = vld [vmem:[%s196_s1 + $0x20] sm:$0xff]  ;;  %s132_s5 = smov [#allocation2]   ;;  %s86_s9 = sshll.u32 %s198_s3, 4  ;;  %s87_s9 = int_to_ptr.hbm [resolvable:$true] %s86_s9 }
   0x4   :  { %v19_v4 = vld [vmem:[%s196_s1 + $0x18] sm:$0xff]  ;;  %v18_v5 = vld [vmem:[%s196_s1 + $0x10] sm:$0xff]  ;;  %v17_v6 = vld [vmem:[%s196_s1 + $0x8] sm:$0xff]  ;;  %s84_s6 = sshll.u32 %s132_s5, 4  ;;  %vm77_vm1 = vcmask 523264   ;;  %s85_s6 = int_to_ptr.vmem [resolvable:$true] %s84_s6 }
   0x5   :  { %v16_v7 = vld [vmem:[%s196_s1] sm:$0xff] }
   0x6   :  { %96 = vmatpush.xpose.msk.msra.mxu0 %vm28_vm0, %v22_v1  ;;  %v15_v8 = vld [vmem:[%s195_s0] sm:$0xff] }
   0x7   :  { %v105_v9 = vld [vmem:[%s197_s2] ss:$0 sm:$0xff] }
   0xa   :  { %97 = vmatpush.xpose.msk.msra.mxu0 %vm28_vm0, %v21_v2 }
   0xe   :  { %98 = vmatpush.xpose.msk.msra.mxu0 %vm28_vm0, %v20_v3 }
  0x12   :  { %99 = vmatpush.xpose.msk.msra.mxu0 %vm28_vm0, %v19_v4 }
  0x16   :  { %100 = vmatpush.xpose.msk.msra.mxu0 %vm28_vm0, %v18_v5 }
  0x1a   :  { %101 = vmatpush.xpose.msk.msra.mxu0 %vm28_vm0, %v17_v6 }
  0x1e   :  { %102 = vmatpush.xpose.msk.msra.mxu0 %vm28_vm0, %v16_v7 }
  0x21   :  { %103 = vmatmul.msk.f32.vlgmr.msra.gmra.mxu0 %vm28_vm0, %v15_v8 }
  0x9e   :  { %v73_v10 = vpop.f32.mrf.mxu0 }
  0x9f   :  { %v74_v11 = vadd.f32 %v105_v9, %v73_v10 }
  0xa1   :  { %v76_v12 = vmax.f32 %v74_v11, 0.0 }
  0xa3   :  { %78 = vst.msk [vmem:[#allocation2] sm:$0xff] %vm77_vm1, %v76_v12 }
  0xa4   :  { %89 = dma.vmem_to_hbm [thread:$0]  %s85_s6, 128, %s87_s9, [#allocation3]  }
  0xa5   :  { %130 = dma.done.wait [#allocation3], 128  }
  0xa6   :  { %131 = vsyncadd [#allocation3], 4294967168 }
  0xa7   :  { %94 = vsyncpa [#allocation3], 1 }

</bundles_post_ra>
